<compile_context>
chip_gen: v6e
topology: v6e:2x2x1
jax: 0.10.0
libtpu: 0.0.40
codegen_flags: <defaults>
</compile_context>

<pallas_src>
import jax
import jax.numpy as jnp
from jax import lax
from jax.experimental import pallas as pl
from jax.experimental.pallas import tpu as pltpu


def _make_avg_kernel(full_t: int, t_block: int):
    """Mean-over-T kernel body. Grid = (batch blocks, T blocks); T axis last."""
    ragged_t = (full_t % t_block) != 0
    inv_t = 1.0 / float(full_t)  # scale by the FULL T, applied only at finalize

    def kernel(x_ref, o_ref, acc_ref):
        ti = pl.program_id(1)

        @pl.when(ti == 0)
        def _init():
            acc_ref[...] = jnp.zeros_like(acc_ref)

        x = x_ref[...]  # (Bb, Tt, D), stays in native dtype (no f32 copy)
        if ragged_t:
            # Mask out padded tail rows of the last T block so they don't
            # contribute to the sum.
            row = lax.broadcasted_iota(jnp.int32, (1, t_block, 1), 1)
            valid = (row + ti * t_block) < full_t
            x = jnp.where(valid, x, jnp.zeros((), x.dtype))

        # Accumulate in f32 without materializing an f32 upcast of the block.
        acc_ref[...] += jnp.sum(x, axis=1, dtype=jnp.float32)

        @pl.when(ti == pl.num_programs(1) - 1)
        def _finalize():
            o_ref[...] = (acc_ref[...] * inv_t).astype(o_ref.dtype)

    return kernel


def _choose_tiles(B, T, D, itemsize, target_bytes=4 * 1024 * 1024):
    """Pick (b_block, t_block) so the input block is ~target_bytes.

    Constraints (TPU (8,128) tiling on the last two block dims):
      * t_block must be a multiple of 8 or equal to T
      * b_block (sublane dim of the (Bb, D) output block) must be a multiple
        of 8 or equal to B
    Double-buffered input stays well under the default scoped VMEM limit on
    all generations (v5e 16 MiB, v6e/v7x 32 MiB), so no vmem_limit_bytes
    override is needed.
    """
    row_bytes = max(1, D * itemsize)  # one T-row of one batch element

    if T * row_bytes <= target_bytes or T <= 8:
        t_block = T
    else:
        t_block = max(8, (target_bytes // row_bytes) // 8 * 8)

    block_row_bytes = t_block * row_bytes
    b_block = max(1, target_bytes // block_row_bytes)
    if b_block >= B:
        b_block = B
    elif b_block >= 8:
        b_block = (b_block // 8) * 8
    else:
        b_block = B if B <= 8 else 8

    # Keep >=2 batch-grid steps when B is large enough so the "parallel"
    # axis can shard across TensorCores (v7x megacore).
    if b_block == B and B >= 16:
        b_block = max(8, (B // 2) // 8 * 8)

    return b_block, t_block


def simple_avg(x, dim=1, *, b_block=None, t_block=None):
    """Pallas equivalent of torch.mean(x, dim) for 3-D (B, T, D) inputs, dim=1."""
    assert x.ndim == 3, "this kernel implements the (B, T, D) layout"
    if dim < 0:
        dim += x.ndim
    assert dim == 1, "kernel specialized to reduction over the T axis (dim=1)"
    # TODO(synk): general `dim` would need a transpose/reshape in the wrapper.

    B, T, D = x.shape
    auto_b, auto_t = _choose_tiles(B, T, D, jnp.dtype(x.dtype).itemsize)
    Bb = auto_b if b_block is None else b_block
    Tt = auto_t if t_block is None else t_block

    grid = (pl.cdiv(B, Bb), pl.cdiv(T, Tt))
    kernel = _make_avg_kernel(T, Tt)

    return pl.pallas_call(
        kernel,
        out_shape=jax.ShapeDtypeStruct((B, D), x.dtype),
        grid_spec=pltpu.PrefetchScalarGridSpec(
            num_scalar_prefetch=0,
            grid=grid,
            in_specs=[pl.BlockSpec((Bb, Tt, D), lambda b, t: (b, t, 0))],
            out_specs=pl.BlockSpec((Bb, D), lambda b, t: (b, 0)),
            scratch_shapes=[pltpu.VMEM((Bb, D), jnp.float32)],
        ),
        compiler_params=pltpu.CompilerParams(
            dimension_semantics=("parallel", "arbitrary"),
        ),
    )(x)


if __name__ == "__main__":
    # Small shape consistent with the module's (B, T, D) usage.
    B, T, D = 2, 8, 32
    x = jax.random.normal(jax.random.PRNGKey(0), (B, T, D), dtype=jnp.float32)
    out = jax.block_until_ready(simple_avg(x, dim=1))
    ref = jnp.mean(x, axis=1)
    assert out.shape == (B, D), out.shape
    assert jnp.allclose(out, ref, atol=1e-5, rtol=1e-5), "mismatch vs reference"

    # Explicitly exercise the tiled path: multi-block batch axis, tiled T
    # reduction with a ragged (masked) last T block.
    B2, T2, D2 = 16, 40, 128
    x2 = jax.random.normal(jax.random.PRNGKey(1), (B2, T2, D2), dtype=jnp.float32)
    out2 = jax.block_until_ready(simple_avg(x2, dim=1, b_block=8, t_block=16))
    ref2 = jnp.mean(x2, axis=1)
    assert out2.shape == (B2, D2), out2.shape
    assert jnp.allclose(out2, ref2, atol=1e-5, rtol=1e-5), "mismatch vs reference (tiled)"

    print("KERNEL_OK")
</pallas_src>

<mosaic_0001>
module attributes {stable_mosaic.version = 11 : i64} {
  func.func @kernel(%arg0: i32, %arg1: i32, %arg2: memref<2x8x32xf32, #tpu.memory_space<vmem>>, %arg3: memref<2x32xf32, #tpu.memory_space<vmem>>, %arg4: memref<2x32xf32, #tpu.memory_space<vmem>>) attributes {dimension_semantics = [#tpu.dimension_semantics<parallel>, #tpu.dimension_semantics<arbitrary>], iteration_bounds = array<i64: 1, 1>, scalar_prefetch = 0 : i64, scratch_operands = 1 : i64, tpu.core_type = #tpu.core_type<tc>, window_params = [{transform_indices = @transform_0, window_bounds = array<i64: 2, 8, 32>}, {transform_indices = @transform_1, window_bounds = array<i64: 2, 32>}]} {
    %c0_i32 = arith.constant 0 : i32
    %0 = arith.cmpi eq, %arg1, %c0_i32 : i32
    %1 = arith.extui %0 : i1 to i32
    %c0_i32_0 = arith.constant 0 : i32
    %2 = arith.cmpi ne, %1, %c0_i32_0 : i32
    scf.if %2 {
      %cst_9 = arith.constant 0.000000e+00 : f32
      %11 = vector.broadcast %cst_9 : f32 to vector<2x32xf32>
      %c0_10 = arith.constant 0 : index
      %c0_11 = arith.constant 0 : index
      %12 = vector.load %arg4[%c0_10, %c0_11] : memref<2x32xf32, #tpu.memory_space<vmem>>, vector<2x32xf32>
      tpu.vector_store %arg4[%c0_10, %c0_11], %11 {strides = array<i32>} : memref<2x32xf32, #tpu.memory_space<vmem>>, vector<2x32xf32>,
    } else {
    }
    %c0 = arith.constant 0 : index
    %c0_1 = arith.constant 0 : index
    %c0_2 = arith.constant 0 : index
    %3 = vector.load %arg2[%c0, %c0_1, %c0_2] : memref<2x8x32xf32, #tpu.memory_space<vmem>>, vector<2x8x32xf32>
    %c0_3 = arith.constant 0 : index
    %c0_4 = arith.constant 0 : index
    %4 = vector.load %arg4[%c0_3, %c0_4] : memref<2x32xf32, #tpu.memory_space<vmem>>, vector<2x32xf32>
    %cst = arith.constant dense<0.000000e+00> : vector<2x32xf32>
    %5 = vector.multi_reduction <add>, %3, %cst [1] : vector<2x8x32xf32> to vector<2x32xf32>
    %6 = arith.addf %4, %5 : vector<2x32xf32>
    %c0_5 = arith.constant 0 : index
    %c0_6 = arith.constant 0 : index
    %7 = vector.load %arg4[%c0_5, %c0_6] : memref<2x32xf32, #tpu.memory_space<vmem>>, vector<2x32xf32>
    tpu.vector_store %arg4[%c0_5, %c0_6], %6 {strides = array<i32>} : memref<2x32xf32, #tpu.memory_space<vmem>>, vector<2x32xf32>,
    %c0_i32_7 = arith.constant 0 : i32
    %8 = arith.cmpi eq, %arg1, %c0_i32_7 : i32
    %9 = arith.extui %8 : i1 to i32
    %c0_i32_8 = arith.constant 0 : i32
    %10 = arith.cmpi ne, %9, %c0_i32_8 : i32
    scf.if %10 {
      %c0_9 = arith.constant 0 : index
      %c0_10 = arith.constant 0 : index
      %11 = vector.load %arg4[%c0_9, %c0_10] : memref<2x32xf32, #tpu.memory_space<vmem>>, vector<2x32xf32>
      %cst_11 = arith.constant 1.250000e-01 : f32
      %12 = vector.broadcast %cst_11 : f32 to vector<2x32xf32>
      %13 = arith.mulf %11, %12 : vector<2x32xf32>
      %c0_12 = arith.constant 0 : index
      %c0_13 = arith.constant 0 : index
      %14 = vector.load %arg3[%c0_12, %c0_13] : memref<2x32xf32, #tpu.memory_space<vmem>>, vector<2x32xf32>
      tpu.vector_store %arg3[%c0_12, %c0_13], %13 {strides = array<i32>} : memref<2x32xf32, #tpu.memory_space<vmem>>, vector<2x32xf32>,
    } else {
    }
    return
  }
  func.func @transform_0(%arg0: i32, %arg1: i32) -> (i32, i32, i32) {
    %c0_i32 = arith.constant 0 : i32
    %c0_i32_0 = arith.constant 0 : i32
    return %arg0, %arg1, %c0_i32 : i32, i32, i32
  }
  func.func @transform_1(%arg0: i32, %arg1: i32) -> (i32, i32) {
    %c0_i32 = arith.constant 0 : i32
    %c0_i32_0 = arith.constant 0 : i32
    return %arg0, %c0_i32 : i32, i32
  }
}

</mosaic_0001>

<bundles_post_ra>
// kernel: tpu_custom_call.1
= control target key start
LH: loop header
LB: loop body
LE: loop exit
PB: predicated region body
PF: predicated region fallthrough
CT: control target
= control target key end

     0   :  { %6 = vsyncpa [#allocation4], 0  ;;  %s149_s0 = inlined_call_operand.hbm [shape: f32[2,8,32], index: 0, kind: input, shape index: {}]   ;;  %s150_s1 = inlined_call_operand.hbm [shape: f32[2,32], index: 1, kind: output, shape index: {}]  }
   0x1   :  { %7 = vsyncpa [#allocation5], 0  ;;  %s125_s6 = smov [#allocation3]  }
   0x2   :  { %s13_s7 = sshll.u32 %s125_s6, 4  ;;  %s14_s7 = int_to_ptr.vmem [resolvable:$true] %s13_s7 }
   0x3   :  { %s89_s8 = scalar_lea.vmem %s14_s7, 256  ;;  %p94_p1 = scmp.lt.s32.totalorder %s14_s7, %s14_s7 }
   0x4   :  { %p90_p0 = scmp.ne.s32.totalorder %s14_s7, %s89_s8  ;;  %p95_p2 = scmp.lt.s32.totalorder %s89_s8, %s89_s8 }
   0x6   :  { %p96_p3 = por %p95_p2, %p94_p1 }
   0x8   :  { %p97_p4 = pnand %p96_p3, %p90_p0 }
   0xa   :  { %100 = shalt.err (!%p97_p4)
}
   0xb   :  { %s126_s9 = smov 128   ;;  %s127_s10 = smov 8  }
   0xc   :  { %19 = dma.hbm_to_vmem [thread:$0]  %s149_s0, 256, %s14_s7, [#allocation4], %s126_s9, %s126_s9, %s127_s10  }
   0xd   :  { %121 = dma.done.wait [#allocation4], 256  }
   0xe   :  { %122 = vsyncadd [#allocation4], 4294967040  ;;  %vm27_vm0 = vcmask 254976   ;;  %v128_v0 = vmov 0.0   ;;  %vm32_vm1 = vcmask 261120   ;;  %v29_v1 = vld [vmem:[#allocation3] sm:$0xff] }
   0xf   :  { %28 = vst.msk [vmem:[#allocation2] sm:$0x3] %vm27_vm0, %v128_v0  ;;  %v30_v2 = vld [vmem:[#allocation3 + $0x8] sm:$0xff]  ;;  %v33_v3 = vsel %vm32_vm1, %v29_v1, 0.0  ;;  %vm49_vm2 = vcmask 1041409   ;;  %s129_s0 = smov [#allocation6]  }
  0x10   :  { %v40_v4 = vsel %vm32_vm1, %v30_v2, 0.0  ;;  %v34_v5 = vrot.slane %v33_v3, 4  ;;  %s67_s13 = sshll.u32 %s129_s0, 4  ;;  %s68_s13 = int_to_ptr.vmem [resolvable:$true] %s67_s13 }
  0x11   :  { %v41_v6 = vrot.slane %v40_v4, 4  ;;  %s101_s14 = scalar_lea.vmem %s68_s13, 32  ;;  %p106_p6 = scmp.lt.s32.totalorder %s68_s13, %s68_s13 }
  0x12   :  { %v35_v7 = vadd.f32 %v34_v5, %v33_v3  ;;  %p102_p5 = scmp.ne.s32.totalorder %s68_s13, %s101_s14  ;;  %p107_p7 = scmp.lt.s32.totalorder %s101_s14, %s101_s14 }
  0x13   :  { %v42_v8 = vadd.f32 %v41_v6, %v40_v4 }
  0x14   :  { %v36_v9 = vrot.slane %v35_v7, 2  ;;  %p108_p8 = por %p107_p7, %p106_p6 }
  0x15   :  { %v43_v10 = vrot.slane %v42_v8, 2 }
  0x16   :  { %v37_v11 = vadd.f32 %v36_v9, %v35_v7  ;;  %v31_v15 = vld [vmem:[#allocation2] sm:$0x3]  ;;  %p109_p9 = pnand %p108_p8, %p102_p5 }
  0x17   :  { %v44_v12 = vadd.f32 %v43_v10, %v42_v8 }
  0x18   :  { %v38_v13 = vrot.slane %v37_v11, 1 }
  0x19   :  { %v45_v14 = vrot.slane %v44_v12, 1 }
  0x1a   :  { %v39_v16 = vadd.f32 %v38_v13, %v37_v11 }
  0x1b   :  { %v46_v17 = vadd.f32 %v45_v14, %v44_v12 }
  0x1d   :  { %v50_v18 = vsel %vm49_vm2, %v46_v17, %v39_v16 }
  0x1e   :  { %v52_v19 = vadd.f32 %v50_v18, %v31_v15 }
  0x20   :  { %54 = vst.msk [vmem:[#allocation2] sm:$0x3] %vm27_vm0, %v52_v19 }
  0x27   :  { %v58_v20 = vld [vmem:[#allocation2] sm:$0x3] }
  0x28   :  { %v59_v21 = vmul.f32 0.125, %v58_v20 }
  0x2a   :  { %60 = vst.msk [vmem:[#allocation6] sm:$0x3] %vm27_vm0, %v59_v21 }
  0x2b   :  { %112 = shalt.err (!%p109_p9)
}
  0x2c   :  { %70 = dma.vmem_to_hbm [thread:$0]  %s68_s13, 32, %s150_s1, [#allocation5]  }
  0x2d   :  { %123 = dma.done.wait [#allocation5], 32  }
  0x2e   :  { %124 = vsyncadd [#allocation5], 4294967264 }
  0x2f   :  { %74 = vsyncpa [#allocation4], 1 }
  0x30   :  { %75 = vsyncpa [#allocation5], 1 }

</bundles_post_ra>
